<compile_context>
chip_gen: v6e
topology: v6e:2x2x1
jax: 0.10.0
libtpu: 0.0.40
codegen_flags: <defaults>
</compile_context>

<pallas_src>
import functools

import jax
import jax.numpy as jnp
from jax.experimental import pallas as pl
from jax.experimental.pallas import tpu as pltpu


def _lstm_kernel(x_ref, wih_ref, whh_ref, b_ref, wfc_ref, bfc_ref,
                 out_ref, xg_ref, *, seq_len, batch, hidden):
    """Single-invocation fused LSTM + max-pool + FC.

    x_ref   : (T*Bp, I)   time-major, batch padded to Bp (multiple of 8)
    wih_ref : (I, 4H)     fused input->gates weight (gate order i,f,g,o)
    whh_ref : (H, 4H)     fused hidden->gates weight
    b_ref   : (1, 4H)     b_ih + b_hh
    wfc_ref : (H, Op)     FC weight, lane-padded to Op (multiple of 128)
    bfc_ref : (1, Op)
    out_ref : (Bp, Op)
    xg_ref  : (T*Bp, 4H)  VMEM scratch: hoisted input projection for all timesteps
    """
    # ---- Phase 1: hoisted input projection for ALL timesteps, bias folded in once ----
    xg_ref[...] = (jnp.dot(x_ref[...], wih_ref[...],
                           preferred_element_type=jnp.float32)
                   + b_ref[...])

    wh = whh_ref[...]  # (H, 4H), kept resident across the recurrence

    def step(t, carry):
        h, c, m = carry
        base = pl.multiple_of(t * batch, batch)          # sublane-aligned start
        gates = (xg_ref[pl.ds(base, batch), :]           # (Bp, 4H) precomputed x-part
                 + jnp.dot(h, wh, preferred_element_type=jnp.float32))

        # One EUP pass over the packed gate slab; tanh only on the g quarter.
        s_all = jax.nn.sigmoid(gates)
        i_g = s_all[:, 0 * hidden:1 * hidden]
        f_g = s_all[:, 1 * hidden:2 * hidden]
        o_g = s_all[:, 3 * hidden:4 * hidden]
        g_g = jnp.tanh(gates[:, 2 * hidden:3 * hidden])

        c_new = f_g * c + i_g * g_g
        h_new = o_g * jnp.tanh(c_new)
        m_new = jnp.maximum(m, h_new)                    # global max-pool over time
        return h_new, c_new, m_new

    zero = jnp.zeros((batch, hidden), jnp.float32)
    neg_inf = jnp.full((batch, hidden), -jnp.inf, jnp.float32)
    _, _, m = jax.lax.fori_loop(0, seq_len, step, (zero, zero, neg_inf), unroll=True)

    # ---- Fused FC head: lane-dense (Bp, Op) store ----
    out_ref[...] = (jnp.dot(m, wfc_ref[...], preferred_element_type=jnp.float32)
                    + bfc_ref[...]).astype(out_ref.dtype)


@jax.jit
def lstm_pallas(x, w_ih, w_hh, b_ih, b_hh, w_fc, b_fc):
    """x: (B, T, I) float32. Returns (B, out_size) float32.

    w_ih: (4H, I), w_hh: (4H, H), b_ih/b_hh: (4H,)  (PyTorch nn.LSTM layout, gates i,f,g,o)
    w_fc: (O, H), b_fc: (O,)
    """
    B, T, I = x.shape
    H = w_hh.shape[1]
    O = w_fc.shape[0]

    Bp = ((B + 7) // 8) * 8          # pad batch to full f32 sublanes
    Op = ((O + 127) // 128) * 128    # pad output lanes -> unmasked lane-dense store

    # ---- Layout prep (cheap XLA glue, outside the kernel) ----
    x_tm = jnp.transpose(x, (1, 0, 2))                       # (T, B, I) time-major
    x_tm = jnp.pad(x_tm, ((0, 0), (0, Bp - B), (0, 0)))      # (T, Bp, I)
    x2d = x_tm.reshape(T * Bp, I)                            # (T*Bp, I)

    wih4 = w_ih.T                                            # (I, 4H), gate blocks i,f,g,o
    whh4 = w_hh.T                                            # (H, 4H)
    b4 = (b_ih + b_hh).reshape(1, 4 * H)                     # (1, 4H)
    wfc_p = jnp.pad(w_fc.T, ((0, 0), (0, Op - O)))           # (H, Op)
    bfc_p = jnp.pad(b_fc, (0, Op - O)).reshape(1, Op)        # (1, Op)

    kernel = functools.partial(_lstm_kernel, seq_len=T, batch=Bp, hidden=H)

    out_p = pl.pallas_call(
        kernel,
        out_shape=jax.ShapeDtypeStruct((Bp, Op), jnp.float32),
        in_specs=[pl.BlockSpec(memory_space=pltpu.MemorySpace.VMEM)] * 6,
        out_specs=pl.BlockSpec(memory_space=pltpu.MemorySpace.VMEM),
        scratch_shapes=[pltpu.VMEM((T * Bp, 4 * H), jnp.float32)],
    )(x2d, wih4, whh4, b4, wfc_p, bfc_p)

    return out_p[:B, :O]


def lstm_ref(x, w_ih, w_hh, b_ih, b_hh, w_fc, b_fc):
    """Pure-JAX reference matching torch.nn.LSTM(batch_first=True) + max-pool + Linear."""
    B, T, I = x.shape
    H = w_hh.shape[1]

    def step(carry, xt):
        h, c = carry
        gates = xt @ w_ih.T + h @ w_hh.T + b_ih + b_hh
        i, f, g, o = jnp.split(gates, 4, axis=-1)
        i = jax.nn.sigmoid(i)
        f = jax.nn.sigmoid(f)
        g = jnp.tanh(g)
        o = jax.nn.sigmoid(o)
        c = f * c + i * g
        h = o * jnp.tanh(c)
        return (h, c), h

    init = (jnp.zeros((B, H), jnp.float32), jnp.zeros((B, H), jnp.float32))
    _, hs = jax.lax.scan(step, init, jnp.transpose(x, (1, 0, 2)))
    pooled = hs.max(axis=0)                 # global_pool=True -> max over time
    return pooled @ w_fc.T + b_fc


if __name__ == "__main__":
    # Module config (defaults of the PyTorch class): hidden_size=16, out_size=5
    B, T, I, H, O = 2, 8, 16, 16, 5

    key = jax.random.PRNGKey(0)
    kx, k1, k2, k3, k4, k5, k6 = jax.random.split(key, 7)

    # Deterministic synthetic params, uniform(-1/sqrt(H), 1/sqrt(H)) like PyTorch init.
    s = 1.0 / jnp.sqrt(jnp.float32(H))
    w_ih = jax.random.uniform(k1, (4 * H, I), jnp.float32, -s, s)
    w_hh = jax.random.uniform(k2, (4 * H, H), jnp.float32, -s, s)
    b_ih = jax.random.uniform(k3, (4 * H,), jnp.float32, -s, s)
    b_hh = jax.random.uniform(k4, (4 * H,), jnp.float32, -s, s)
    w_fc = jax.random.uniform(k5, (O, H), jnp.float32, -s, s)
    b_fc = jax.random.uniform(k6, (O,), jnp.float32, -s, s)

    x = jax.random.normal(kx, (B, T, I), jnp.float32)

    out = lstm_pallas(x, w_ih, w_hh, b_ih, b_hh, w_fc, b_fc)
    out = jax.block_until_ready(out)

    ref = lstm_ref(x, w_ih, w_hh, b_ih, b_hh, w_fc, b_fc)
    assert out.shape == (B, O)
    assert jnp.allclose(out, ref, atol=1e-5, rtol=1e-5), (out, ref)

    print("KERNEL_OK")
</pallas_src>

<mosaic_0001>
module attributes {stable_mosaic.version = 11 : i64} {
  func.func @_lstm_kernel(%arg0: memref<64x16xf32, #tpu.memory_space<vmem>>, %arg1: memref<16x64xf32, #tpu.memory_space<vmem>>, %arg2: memref<16x64xf32, #tpu.memory_space<vmem>>, %arg3: memref<1x64xf32, #tpu.memory_space<vmem>>, %arg4: memref<16x128xf32, #tpu.memory_space<vmem>>, %arg5: memref<1x128xf32, #tpu.memory_space<vmem>>, %arg6: memref<8x128xf32, #tpu.memory_space<vmem>>, %arg7: memref<64x64xf32, #tpu.memory_space<vmem>>) attributes {dimension_semantics = [], scalar_prefetch = 0 : i64, scratch_operands = 1 : i64, tpu.core_type = #tpu.core_type<tc>} {
    %c0 = arith.constant 0 : index
    %c0_0 = arith.constant 0 : index
    %0 = vector.load %arg0[%c0, %c0_0] : memref<64x16xf32, #tpu.memory_space<vmem>>, vector<64x16xf32>
    %c0_1 = arith.constant 0 : index
    %c0_2 = arith.constant 0 : index
    %1 = vector.load %arg1[%c0_1, %c0_2] : memref<16x64xf32, #tpu.memory_space<vmem>>, vector<16x64xf32>
    %cst = arith.constant dense<0.000000e+00> : vector<64x64xf32>
    %2 = tpu.matmul %0, %1, %cst {dimension_numbers = #tpu.dot_dimension_numbers<[1], [0], [0], [1], [0, 0, 1, 1], [], []>} : vector<64x16xf32>, vector<16x64xf32>, vector<64x64xf32> -> vector<64x64xf32>
    %c0_3 = arith.constant 0 : index
    %c0_4 = arith.constant 0 : index
    %3 = vector.load %arg3[%c0_3, %c0_4] : memref<1x64xf32, #tpu.memory_space<vmem>>, vector<1x64xf32>
    %4 = vector.broadcast %3 : vector<1x64xf32> to vector<64x64xf32>
    %5 = arith.addf %2, %4 : vector<64x64xf32>
    %c0_5 = arith.constant 0 : index
    %c0_6 = arith.constant 0 : index
    %6 = vector.load %arg7[%c0_5, %c0_6] : memref<64x64xf32, #tpu.memory_space<vmem>>, vector<64x64xf32>
    tpu.vector_store %arg7[%c0_5, %c0_6], %5 {strides = array<i32>} : memref<64x64xf32, #tpu.memory_space<vmem>>, vector<64x64xf32>,
    %c0_7 = arith.constant 0 : index
    %c0_8 = arith.constant 0 : index
    %7 = vector.load %arg2[%c0_7, %c0_8] : memref<16x64xf32, #tpu.memory_space<vmem>>, vector<16x64xf32>
    %cst_9 = arith.constant 0.000000e+00 : f32
    %8 = vector.broadcast %cst_9 : f32 to vector<8x16xf32>
    %cst_10 = arith.constant 0xFF800000 : f32
    %9 = vector.broadcast %cst_10 : f32 to vector<8x16xf32>
    %c0_i32 = arith.constant 0 : i32
    %c8_i32 = arith.constant 8 : i32
    %10 = arith.muli %c0_i32, %c8_i32 : i32
    %11 = tpu.assume_multiple %10, 8 : i32
    %12 = arith.index_cast %11 : i32 to index
    %c0_11 = arith.constant 0 : index
    %13 = vector.load %arg7[%12, %c0_11] : memref<64x64xf32, #tpu.memory_space<vmem>>, vector<8x64xf32>
    %cst_12 = arith.constant dense<0.000000e+00> : vector<8x64xf32>
    %14 = tpu.matmul %8, %7, %cst_12 {dimension_numbers = #tpu.dot_dimension_numbers<[1], [0], [0], [1], [0, 0, 1, 1], [], []>} : vector<8x16xf32>, vector<16x64xf32>, vector<8x64xf32> -> vector<8x64xf32>
    %15 = arith.addf %13, %14 : vector<8x64xf32>
    %16 = arith.negf %15 : vector<8x64xf32>
    %17 = math.exp %16 : vector<8x64xf32>
    %cst_13 = arith.constant 1.000000e+00 : f32
    %18 = vector.broadcast %cst_13 : f32 to vector<8x64xf32>
    %19 = arith.addf %18, %17 : vector<8x64xf32>
    %20 = arith.divf %18, %19 : vector<8x64xf32>
    %21 = vector.extract_strided_slice %20 {offsets = [0, 0], sizes = [8, 16], strides = [1, 1]} : vector<8x64xf32> to vector<8x16xf32>
    %22 = vector.extract_strided_slice %20 {offsets = [0, 16], sizes = [8, 16], strides = [1, 1]} : vector<8x64xf32> to vector<8x16xf32>
    %23 = vector.extract_strided_slice %20 {offsets = [0, 48], sizes = [8, 16], strides = [1, 1]} : vector<8x64xf32> to vector<8x16xf32>
    %24 = vector.extract_strided_slice %15 {offsets = [0, 32], sizes = [8, 16], strides = [1, 1]} : vector<8x64xf32> to vector<8x16xf32>
    %25 = math.tanh %24 : vector<8x16xf32>
    %26 = arith.mulf %22, %8 : vector<8x16xf32>
    %27 = arith.mulf %21, %25 : vector<8x16xf32>
    %28 = arith.addf %26, %27 : vector<8x16xf32>
    %29 = math.tanh %28 : vector<8x16xf32>
    %30 = arith.mulf %23, %29 : vector<8x16xf32>
    %31 = arith.maximumf %9, %30 : vector<8x16xf32>
    %c1_i32 = arith.constant 1 : i32
    %c8_i32_14 = arith.constant 8 : i32
    %32 = arith.muli %c1_i32, %c8_i32_14 : i32
    %33 = tpu.assume_multiple %32, 8 : i32
    %34 = arith.index_cast %33 : i32 to index
    %c0_15 = arith.constant 0 : index
    %35 = vector.load %arg7[%34, %c0_15] : memref<64x64xf32, #tpu.memory_space<vmem>>, vector<8x64xf32>
    %cst_16 = arith.constant dense<0.000000e+00> : vector<8x64xf32>
    %36 = tpu.matmul %30, %7, %cst_16 {dimension_numbers = #tpu.dot_dimension_numbers<[1], [0], [0], [1], [0, 0, 1, 1], [], []>} : vector<8x16xf32>, vector<16x64xf32>, vector<8x64xf32> -> vector<8x64xf32>
    %37 = arith.addf %35, %36 : vector<8x64xf32>
    %38 = arith.negf %37 : vector<8x64xf32>
    %39 = math.exp %38 : vector<8x64xf32>
    %cst_17 = arith.constant 1.000000e+00 : f32
    %40 = vector.broadcast %cst_17 : f32 to vector<8x64xf32>
    %41 = arith.addf %40, %39 : vector<8x64xf32>
    %42 = arith.divf %40, %41 : vector<8x64xf32>
    %43 = vector.extract_strided_slice %42 {offsets = [0, 0], sizes = [8, 16], strides = [1, 1]} : vector<8x64xf32> to vector<8x16xf32>
    %44 = vector.extract_strided_slice %42 {offsets = [0, 16], sizes = [8, 16], strides = [1, 1]} : vector<8x64xf32> to vector<8x16xf32>
    %45 = vector.extract_strided_slice %42 {offsets = [0, 48], sizes = [8, 16], strides = [1, 1]} : vector<8x64xf32> to vector<8x16xf32>
    %46 = vector.extract_strided_slice %37 {offsets = [0, 32], sizes = [8, 16], strides = [1, 1]} : vector<8x64xf32> to vector<8x16xf32>
    %47 = math.tanh %46 : vector<8x16xf32>
    %48 = arith.mulf %44, %28 : vector<8x16xf32>
    %49 = arith.mulf %43, %47 : vector<8x16xf32>
    %50 = arith.addf %48, %49 : vector<8x16xf32>
    %51 = math.tanh %50 : vector<8x16xf32>
    %52 = arith.mulf %45, %51 : vector<8x16xf32>
    %53 = arith.maximumf %31, %52 : vector<8x16xf32>
    %c2_i32 = arith.constant 2 : i32
    %c8_i32_18 = arith.constant 8 : i32
    %54 = arith.muli %c2_i32, %c8_i32_18 : i32
    %55 = tpu.assume_multiple %54, 8 : i32
    %56 = arith.index_cast %55 : i32 to index
    %c0_19 = arith.constant 0 : index
    %57 = vector.load %arg7[%56, %c0_19] : memref<64x64xf32, #tpu.memory_space<vmem>>, vector<8x64xf32>
    %cst_20 = arith.constant dense<0.000000e+00> : vector<8x64xf32>
    %58 = tpu.matmul %52, %7, %cst_20 {dimension_numbers = #tpu.dot_dimension_numbers<[1], [0], [0], [1], [0, 0, 1, 1], [], []>} : vector<8x16xf32>, vector<16x64xf32>, vector<8x64xf32> -> vector<8x64xf32>
    %59 = arith.addf %57, %58 : vector<8x64xf32>
    %60 = arith.negf %59 : vector<8x64xf32>
    %61 = math.exp %60 : vector<8x64xf32>
    %cst_21 = arith.constant 1.000000e+00 : f32
    %62 = vector.broadcast %cst_21 : f32 to vector<8x64xf32>
    %63 = arith.addf %62, %61 : vector<8x64xf32>
    %64 = arith.divf %62, %63 : vector<8x64xf32>
    %65 = vector.extract_strided_slice %64 {offsets = [0, 0], sizes = [8, 16], strides = [1, 1]} : vector<8x64xf32> to vector<8x16xf32>
    %66 = vector.extract_strided_slice %64 {offsets = [0, 16], sizes = [8, 16], strides = [1, 1]} : vector<8x64xf32> to vector<8x16xf32>
    %67 = vector.extract_strided_slice %64 {offsets = [0, 48], sizes = [8, 16], strides = [1, 1]} : vector<8x64xf32> to vector<8x16xf32>
    %68 = vector.extract_strided_slice %59 {offsets = [0, 32], sizes = [8, 16], strides = [1, 1]} : vector<8x64xf32> to vector<8x16xf32>
    %69 = math.tanh %68 : vector<8x16xf32>
    %70 = arith.mulf %66, %50 : vector<8x16xf32>
    %71 = arith.mulf %65, %69 : vector<8x16xf32>
    %72 = arith.addf %70, %71 : vector<8x16xf32>
    %73 = math.tanh %72 : vector<8x16xf32>
    %74 = arith.mulf %67, %73 : vector<8x16xf32>
    %75 = arith.maximumf %53, %74 : vector<8x16xf32>
    %c3_i32 = arith.constant 3 : i32
    %c8_i32_22 = arith.constant 8 : i32
    %76 = arith.muli %c3_i32, %c8_i32_22 : i32
    %77 = tpu.assume_multiple %76, 8 : i32
    %78 = arith.index_cast %77 : i32 to index
    %c0_23 = arith.constant 0 : index
    %79 = vector.load %arg7[%78, %c0_23] : memref<64x64xf32, #tpu.memory_space<vmem>>, vector<8x64xf32>
    %cst_24 = arith.constant dense<0.000000e+00> : vector<8x64xf32>
    %80 = tpu.matmul %74, %7, %cst_24 {dimension_numbers = #tpu.dot_dimension_numbers<[1], [0], [0], [1], [0, 0, 1, 1], [], []>} : vector<8x16xf32>, vector<16x64xf32>, vector<8x64xf32> -> vector<8x64xf32>
    %81 = arith.addf %79, %80 : vector<8x64xf32>
    %82 = arith.negf %81 : vector<8x64xf32>
    %83 = math.exp %82 : vector<8x64xf32>
    %cst_25 = arith.constant 1.000000e+00 : f32
    %84 = vector.broadcast %cst_25 : f32 to vector<8x64xf32>
    %85 = arith.addf %84, %83 : vector<8x64xf32>
    %86 = arith.divf %84, %85 : vector<8x64xf32>
    %87 = vector.extract_strided_slice %86 {offsets = [0, 0], sizes = [8, 16], strides = [1, 1]} : vector<8x64xf32> to vector<8x16xf32>
    %88 = vector.extract_strided_slice %86 {offsets = [0, 16], sizes = [8, 16], strides = [1, 1]} : vector<8x64xf32> to vector<8x16xf32>
    %89 = vector.extract_strided_slice %86 {offsets = [0, 48], sizes = [8, 16], strides = [1, 1]} : vector<8x64xf32> to vector<8x16xf32>
    %90 = vector.extract_strided_slice %81 {offsets = [0, 32], sizes = [8, 16], strides = [1, 1]} : vector<8x64xf32> to vector<8x16xf32>
    %91 = math.tanh %90 : vector<8x16xf32>
    %92 = arith.mulf %88, %72 : vector<8x16xf32>
    %93 = arith.mulf %87, %91 : vector<8x16xf32>
    %94 = arith.addf %92, %93 : vector<8x16xf32>
    %95 = math.tanh %94 : vector<8x16xf32>
    %96 = arith.mulf %89, %95 : vector<8x16xf32>
    %97 = arith.maximumf %75, %96 : vector<8x16xf32>
    %c4_i32 = arith.constant 4 : i32
    %c8_i32_26 = arith.constant 8 : i32
    %98 = arith.muli %c4_i32, %c8_i32_26 : i32
    %99 = tpu.assume_multiple %98, 8 : i32
    %100 = arith.index_cast %99 : i32 to index
    %c0_27 = arith.constant 0 : index
    %101 = vector.load %arg7[%100, %c0_27] : memref<64x64xf32, #tpu.memory_space<vmem>>, vector<8x64xf32>
    %cst_28 = arith.constant dense<0.000000e+00> : vector<8x64xf32>
    %102 = tpu.matmul %96, %7, %cst_28 {dimension_numbers = #tpu.dot_dimension_numbers<[1], [0], [0], [1], [0, 0, 1, 1], [], []>} : vector<8x16xf32>, vector<16x64xf32>, vector<8x64xf32> -> vector<8x64xf32>
    %103 = arith.addf %101, %102 : vector<8x64xf32>
    %104 = arith.negf %103 : vector<8x64xf32>
    %105 = math.exp %104 : vector<8x64xf32>
    %cst_29 = arith.constant 1.000000e+00 : f32
    %106 = vector.broadcast %cst_29 : f32 to vector<8x64xf32>
    %107 = arith.addf %106, %105 : vector<8x64xf32>
    %108 = arith.divf %106, %107 : vector<8x64xf32>
    %109 = vector.extract_strided_slice %108 {offsets = [0, 0], sizes = [8, 16], strides = [1, 1]} : vector<8x64xf32> to vector<8x16xf32>
    %110 = vector.extract_strided_slice %108 {offsets = [0, 16], sizes = [8, 16], strides = [1, 1]} : vector<8x64xf32> to vector<8x16xf32>
    %111 = vector.extract_strided_slice %108 {offsets = [0, 48], sizes = [8, 16], strides = [1, 1]} : vector<8x64xf32> to vector<8x16xf32>
    %112 = vector.extract_strided_slice %103 {offsets = [0, 32], sizes = [8, 16], strides = [1, 1]} : vector<8x64xf32> to vector<8x16xf32>
    %113 = math.tanh %112 : vector<8x16xf32>
    %114 = arith.mulf %110, %94 : vector<8x16xf32>
    %115 = arith.mulf %109, %113 : vector<8x16xf32>
    %116 = arith.addf %114, %115 : vector<8x16xf32>
    %117 = math.tanh %116 : vector<8x16xf32>
    %118 = arith.mulf %111, %117 : vector<8x16xf32>
    %119 = arith.maximumf %97, %118 : vector<8x16xf32>
    %c5_i32 = arith.constant 5 : i32
    %c8_i32_30 = arith.constant 8 : i32
    %120 = arith.muli %c5_i32, %c8_i32_30 : i32
    %121 = tpu.assume_multiple %120, 8 : i32
    %122 = arith.index_cast %121 : i32 to index
    %c0_31 = arith.constant 0 : index
    %123 = vector.load %arg7[%122, %c0_31] : memref<64x64xf32, #tpu.memory_space<vmem>>, vector<8x64xf32>
    %cst_32 = arith.constant dense<0.000000e+00> : vector<8x64xf32>
    %124 = tpu.matmul %118, %7, %cst_32 {dimension_numbers = #tpu.dot_dimension_numbers<[1], [0], [0], [1], [0, 0, 1, 1], [], []>} : vector<8x16xf32>, vector<16x64xf32>, vector<8x64xf32> -> vector<8x64xf32>
    %125 = arith.addf %123, %124 : vector<8x64xf32>
    %126 = arith.negf %125 : vector<8x64xf32>
    %127 = math.exp %126 : vector<8x64xf32>
    %cst_33 = arith.constant 1.000000e+00 : f32
    %128 = vector.broadcast %cst_33 : f32 to vector<8x64xf32>
    %129 = arith.addf %128, %127 : vector<8x64xf32>
    %130 = arith.divf %128, %129 : vector<8x64xf32>
    %131 = vector.extract_strided_slice %130 {offsets = [0, 0], sizes = [8, 16], strides = [1, 1]} : vector<8x64xf32> to vector<8x16xf32>
    %132 = vector.extract_strided_slice %130 {offsets = [0, 16], sizes = [8, 16], strides = [1, 1]} : vector<8x64xf32> to vector<8x16xf32>
    %133 = vector.extract_strided_slice %130 {offsets = [0, 48], sizes = [8, 16], strides = [1, 1]} : vector<8x64xf32> to vector<8x16xf32>
    %134 = vector.extract_strided_slice %125 {offsets = [0, 32], sizes = [8, 16], strides = [1, 1]} : vector<8x64xf32> to vector<8x16xf32>
    %135 = math.tanh %134 : vector<8x16xf32>
    %136 = arith.mulf %132, %116 : vector<8x16xf32>
    %137 = arith.mulf %131, %135 : vector<8x16xf32>
    %138 = arith.addf %136, %137 : vector<8x16xf32>
    %139 = math.tanh %138 : vector<8x16xf32>
    %140 = arith.mulf %133, %139 : vector<8x16xf32>
    %141 = arith.maximumf %119, %140 : vector<8x16xf32>
    %c6_i32 = arith.constant 6 : i32
    %c8_i32_34 = arith.constant 8 : i32
    %142 = arith.muli %c6_i32, %c8_i32_34 : i32
    %143 = tpu.assume_multiple %142, 8 : i32
    %144 = arith.index_cast %143 : i32 to index
    %c0_35 = arith.constant 0 : index
    %145 = vector.load %arg7[%144, %c0_35] : memref<64x64xf32, #tpu.memory_space<vmem>>, vector<8x64xf32>
    %cst_36 = arith.constant dense<0.000000e+00> : vector<8x64xf32>
    %146 = tpu.matmul %140, %7, %cst_36 {dimension_numbers = #tpu.dot_dimension_numbers<[1], [0], [0], [1], [0, 0, 1, 1], [], []>} : vector<8x16xf32>, vector<16x64xf32>, vector<8x64xf32> -> vector<8x64xf32>
    %147 = arith.addf %145, %146 : vector<8x64xf32>
    %148 = arith.negf %147 : vector<8x64xf32>
    %149 = math.exp %148 : vector<8x64xf32>
    %cst_37 = arith.constant 1.000000e+00 : f32
    %150 = vector.broadcast %cst_37 : f32 to vector<8x64xf32>
    %151 = arith.addf %150, %149 : vector<8x64xf32>
    %152 = arith.divf %150, %151 : vector<8x64xf32>
    %153 = vector.extract_strided_slice %152 {offsets = [0, 0], sizes = [8, 16], strides = [1, 1]} : vector<8x64xf32> to vector<8x16xf32>
    %154 = vector.extract_strided_slice %152 {offsets = [0, 16], sizes = [8, 16], strides = [1, 1]} : vector<8x64xf32> to vector<8x16xf32>
    %155 = vector.extract_strided_slice %152 {offsets = [0, 48], sizes = [8, 16], strides = [1, 1]} : vector<8x64xf32> to vector<8x16xf32>
    %156 = vector.extract_strided_slice %147 {offsets = [0, 32], sizes = [8, 16], strides = [1, 1]} : vector<8x64xf32> to vector<8x16xf32>
    %157 = math.tanh %156 : vector<8x16xf32>
    %158 = arith.mulf %154, %138 : vector<8x16xf32>
    %159 = arith.mulf %153, %157 : vector<8x16xf32>
    %160 = arith.addf %158, %159 : vector<8x16xf32>
    %161 = math.tanh %160 : vector<8x16xf32>
    %162 = arith.mulf %155, %161 : vector<8x16xf32>
    %163 = arith.maximumf %141, %162 : vector<8x16xf32>
    %c7_i32 = arith.constant 7 : i32
    %c8_i32_38 = arith.constant 8 : i32
    %164 = arith.muli %c7_i32, %c8_i32_38 : i32
    %165 = tpu.assume_multiple %164, 8 : i32
    %166 = arith.index_cast %165 : i32 to index
    %c0_39 = arith.constant 0 : index
    %167 = vector.load %arg7[%166, %c0_39] : memref<64x64xf32, #tpu.memory_space<vmem>>, vector<8x64xf32>
    %cst_40 = arith.constant dense<0.000000e+00> : vector<8x64xf32>
    %168 = tpu.matmul %162, %7, %cst_40 {dimension_numbers = #tpu.dot_dimension_numbers<[1], [0], [0], [1], [0, 0, 1, 1], [], []>} : vector<8x16xf32>, vector<16x64xf32>, vector<8x64xf32> -> vector<8x64xf32>
    %169 = arith.addf %167, %168 : vector<8x64xf32>
    %170 = arith.negf %169 : vector<8x64xf32>
    %171 = math.exp %170 : vector<8x64xf32>
    %cst_41 = arith.constant 1.000000e+00 : f32
    %172 = vector.broadcast %cst_41 : f32 to vector<8x64xf32>
    %173 = arith.addf %172, %171 : vector<8x64xf32>
    %174 = arith.divf %172, %173 : vector<8x64xf32>
    %175 = vector.extract_strided_slice %174 {offsets = [0, 0], sizes = [8, 16], strides = [1, 1]} : vector<8x64xf32> to vector<8x16xf32>
    %176 = vector.extract_strided_slice %174 {offsets = [0, 16], sizes = [8, 16], strides = [1, 1]} : vector<8x64xf32> to vector<8x16xf32>
    %177 = vector.extract_strided_slice %174 {offsets = [0, 48], sizes = [8, 16], strides = [1, 1]} : vector<8x64xf32> to vector<8x16xf32>
    %178 = vector.extract_strided_slice %169 {offsets = [0, 32], sizes = [8, 16], strides = [1, 1]} : vector<8x64xf32> to vector<8x16xf32>
    %179 = math.tanh %178 : vector<8x16xf32>
    %180 = arith.mulf %176, %160 : vector<8x16xf32>
    %181 = arith.mulf %175, %179 : vector<8x16xf32>
    %182 = arith.addf %180, %181 : vector<8x16xf32>
    %183 = math.tanh %182 : vector<8x16xf32>
    %184 = arith.mulf %177, %183 : vector<8x16xf32>
    %185 = arith.maximumf %163, %184 : vector<8x16xf32>
    %c8_i32_42 = arith.constant 8 : i32
    %c0_43 = arith.constant 0 : index
    %c0_44 = arith.constant 0 : index
    %186 = vector.load %arg4[%c0_43, %c0_44] : memref<16x128xf32, #tpu.memory_space<vmem>>, vector<16x128xf32>
    %cst_45 = arith.constant dense<0.000000e+00> : vector<8x128xf32>
    %187 = tpu.matmul %185, %186, %cst_45 {dimension_numbers = #tpu.dot_dimension_numbers<[1], [0], [0], [1], [0, 0, 1, 1], [], []>} : vector<8x16xf32>, vector<16x128xf32>, vector<8x128xf32> -> vector<8x128xf32>
    %c0_46 = arith.constant 0 : index
    %c0_47 = arith.constant 0 : index
    %188 = vector.load %arg5[%c0_46, %c0_47] : memref<1x128xf32, #tpu.memory_space<vmem>>, vector<1x128xf32>
    %189 = vector.broadcast %188 : vector<1x128xf32> to vector<8x128xf32>
    %190 = arith.addf %187, %189 : vector<8x128xf32>
    %c0_48 = arith.constant 0 : index
    %c0_49 = arith.constant 0 : index
    %191 = vector.load %arg6[%c0_48, %c0_49] : memref<8x128xf32, #tpu.memory_space<vmem>>, vector<8x128xf32>
    tpu.vector_store %arg6[%c0_48, %c0_49], %190 {strides = array<i32>} : memref<8x128xf32, #tpu.memory_space<vmem>>, vector<8x128xf32>,
    return
  }
}

</mosaic_0001>

<bundles_post_ra>
// kernel: lstm_pallas.1
= control target key start
LH: loop header
LB: loop body
LE: loop exit
PB: predicated region body
PF: predicated region fallthrough
CT: control target
= control target key end

     0   :  { %vm40_vm0 = vcmask 130048   ;;  %v1302_v3 = vmov 0.0   ;;  %vm1303_vm1 = vmmov 0   ;;  %vm170_vm2 = vcmask 523264   ;;  %s1304_s9 = smov 96   ;;  %s1306_s10 = smov 32   ;;  %s1524_s1 = inlined_call_operand.vmem [shape: f32[16,64], index: 1, kind: input, shape index: {}]   ;;  %s1525_s0 = inlined_call_operand.vmem [shape: f32[64,16], index: 0, kind: input, shape index: {}]   ;;  %s1526_s2 = inlined_call_operand.vmem [shape: f32[16,64], index: 2, kind: input, shape index: {}]   ;;  %s1527_s3 = inlined_call_operand.vmem [shape: f32[1,64], index: 3, kind: input, shape index: {}]   ;;  %s1528_s4 = inlined_call_operand.vmem [shape: f32[16,128], index: 4, kind: input, shape index: {}]   ;;  %s1529_s5 = inlined_call_operand.vmem [shape: f32[1,128], index: 5, kind: input, shape index: {}]   ;;  %s1530_s6 = inlined_call_operand.vmem [shape: f32[8,128], index: 6, kind: output, shape index: {}]  }
   0x1   :  { %v32_v0 = vld [vmem:[%s1524_s1 + $0x8] sm:$0xff]  ;;  %v31_v1 = vld [vmem:[%s1524_s1] sm:$0xff]  ;;  %1169 = vmatprep.subr.mxu1 %v1302_v3  ;;  %1173 = vmatprep.mubr.msk.f32.mxu1 %vm1303_vm1, %v1302_v3  ;;  %s1307_s11 = smov 80   ;;  %v25_v44 = vld [vmem:[%s1525_s0 + $0x10] sm:$0xff] }
   0x2   :  { %v23_v2 = vld [vmem:[%s1525_s0] sm:$0xff]  ;;  %1153 = vmatprep.subr.mxu0 %v32_v0  ;;  %v1359_v4 = vld [vmem:[%s1526_s2 + $0x8] sm:$0xff]  ;;  %v26_v45 = vld [vmem:[%s1525_s0 + $0x18] sm:$0xff] }
   0x3   :  { %1157 = vmatprep.mubr.msk.f32.mxu0 %vm40_vm0, %v23_v2  ;;  %v1364_v5 = vld [vmem:[%s1526_s2] sm:$0xff]  ;;  %1154 = vmatpush3.msra.mxu0 %v32_v0  ;;  %v24_v6 = vld [vmem:[%s1525_s0 + $0x8] sm:$0xff] }
   0x4   :  { %1170 = vmatpush3.msra.mxu1 %v1359_v4  ;;  %1155 = vmatprep.subr.mxu0 %v31_v1  ;;  %v1389_v7 = vld [vmem:[%s1527_s3] ss:$0 sm:$0xff]  ;;  %s1305_s3 = smov 16  }
   0x5   :  { %1171 = vmatprep.subr.mxu1 %v1302_v3  ;;  %1156 = vmatpush3.msra.mxu0 %v31_v1 }
   0x6   :  { %1172 = vmatpush3.msra.mxu1 %v1364_v5  ;;  %1158 = vmatmul.mubr.msk.f32.vlgmr.msra.gmra.mxu0 %vm40_vm0, %v24_v6 }
   0x7   :  { %1174 = vmatmul.mubr.f32.vlgmr.msra.gmra.mxu1 %v1302_v3  ;;  %1176 = vmatprep.subr.mxu1 %v1302_v3 }
   0x8   :  { %1180 = vmatprep.mubr.msk.f32.mxu1 %vm1303_vm1, %v1302_v3  ;;  %1177 = vmatpush3.msra.mxu1 %v1359_v4 }
   0x9   :  { %1197 = vmatprep.subr.mxu0 %v1302_v3  ;;  %1178 = vmatprep.subr.mxu1 %v1302_v3 }
   0xa   :  { %1198 = vmatpush3.msra.mxu0 %v1359_v4  ;;  %1179 = vmatpush3.msra.mxu1 %v1364_v5 }
   0xb   :  { %1199 = vmatprep.subr.mxu0 %v1302_v3  ;;  %1183 = vmatprep.subr.mxu1 %v1302_v3 }
   0xc   :  { %1200 = vmatpush3.msra.mxu0 %v1364_v5  ;;  %1160 = vmatprep.mubr.msk.f32.mxu0 %vm40_vm0, %v25_v44 }
   0xd   :  { %1211 = vmatprep.subr.mxu0 %v1302_v3  ;;  %1161 = vmatmul.mubr.msk.f32.gmra.mxu0 %vm40_vm0, %v26_v45 }
  0xc6   :  { %v1159_v8 = vpop.f32.mrf.mxu0 }
  0xc7   :  { %v251_v9 = vpop.f32.mrf.mxu1  ;;  %v137_v10 = vadd.f32 %v1159_v8, %v1389_v7 }
  0xc8   :  { %v131_v11 = vpop.f32.mrf.mxu0 }
  0xc9   :  { %v1175_v12 = vpop.f32.mrf.mxu1  ;;  %172 = vst.msk [vmem:[#allocation2 + $0x8] sm:$0xff] %vm170_vm2, %v137_v10  ;;  %v132_v13 = vadd.f32 %v1389_v7, %v131_v11 }
  0xcb   :  { %171 = vst.msk [vmem:[#allocation2] sm:$0xff] %vm170_vm2, %v132_v13 }
  0xcd   :  { %v1162_v49 = vpop.f32.mrf.mxu0 }
  0xce   :  { %v147_v50 = vadd.f32 %v1162_v49, %v1389_v7 }
  0xcf   :  { %v141_v51 = vpop.f32.mrf.mxu0 }
  0xd0   :  { %v281_v30 = vld [vmem:[#allocation2 + $0x8] sm:$0xff]  ;;  %174 = vst.msk [vmem:[#allocation2 + $0x18] sm:$0xff] %vm170_vm2, %v147_v50  ;;  %v142_v52 = vadd.f32 %v1389_v7, %v141_v51 }
  0xd2   :  { %v181_v14 = vld [vmem:[#allocation2] sm:$0xff]  ;;  %173 = vst.msk [vmem:[#allocation2 + $0x10] sm:$0xff] %vm170_vm2, %v142_v52 }
  0xd3   :  { %v255_v15 = vadd.f32 %v251_v9, %v181_v14 }
  0xd5   :  { %1238 = vtanh.f32 %v255_v15  ;;  %v1099_v17 = vmul.f32 -1.442695, %v255_v15 }
  0xd7   :  { %1240 = vpow2.f32 %v1099_v17  ;;  %v487_v14 = vld [vmem:[#allocation2 + $0x18] sm:$0xff] }
  0xd9   :  { %v384_v54 = vld [vmem:[#allocation2 + $0x10] sm:$0xff] }
  0xe2   :  { %v1239_v16 = vpop.eup %1238 }
  0xe3   :  { %265 = vrot.lane.b32.xlu0 %v1239_v16, %s1304_s9 }
  0xe4   :  { %v1241_v18 = vpop.eup %1240 }
  0xe5   :  { %v259_v19 = vadd.f32 1.0, %v1241_v18 }
  0xe7   :  { %1242 = vrcp.f32 %v259_v19 }
  0xf4   :  { %v1243_v20 = vpop.eup %1242 }
  0xf5   :  { %v263_v23 = vmul.f32 0.0, %v1243_v20 }
 0x155   :  { %v266_v21 = vpop.permute.xlu0 %265 }
 0x156   :  { %v268_v22 = vmul.f32 %v1243_v20, %v266_v21 }
 0x158   :  { %270 = vrot.lane.b32.xlu0 %v268_v22, %s1305_s3 }
 0x1ca   :  { %v271_v24 = vpop.permute.xlu0 %270 }
 0x1cb   :  { %v273_v25 = vadd.f32 %v271_v24, %v263_v23 }
 0x1cd   :  { %1244 = vtanh.f32 %v273_v25 }
 0x1da   :  { %v1245_v26 = vpop.eup %1244 }
 0x1db   :  { %276 = vrot.lane.b32.xlu1 %v1245_v26, %s1306_s10 }
 0x24d   :  { %v277_v27 = vpop.permute.xlu1 %276 }
 0x24e   :  { %v1398_v28 = vmul.f32 %v1243_v20, %v277_v27 }
 0x250   :  { %283 = vrot.lane.b32.xlu1 %v1398_v28, %s1307_s11 }
 0x2c2   :  { %v284_v29 = vpop.permute.xlu1 %283 }
 0x2c3   :  { %1181 = vmatmul.mubr.msk.f32.vlgmr.msra.gmra.mxu1 %vm40_vm0, %v284_v29  ;;  %v28_v29 = vld [vmem:[%s1525_s0 + $0x28] sm:$0xff] }
 0x2c4   :  { %1184 = vmatpush3.msra.mxu1 %v1359_v4  ;;  %1187 = vmatprep.mubr.msk.f32.mxu1 %vm1303_vm1, %v1302_v3 }
 0x2c5   :  { %1185 = vmatprep.subr.mxu1 %v1302_v3 }
 0x2c6   :  { %1186 = vmatpush3.msra.mxu1 %v1364_v5 }
 0x2c7   :  { %1190 = vmatprep.subr.mxu1 %v1302_v3 }
 0x383   :  { %v353_v31 = vpop.f32.mrf.mxu1 }
 0x384   :  { %v357_v32 = vadd.f32 %v353_v31, %v281_v30  ;;  %v29_v30 = vld [vmem:[%s1525_s0 + $0x30] sm:$0xff]  ;;  %v30_v31 = vld [vmem:[%s1525_s0 + $0x38] sm:$0xff] }
 0x385   :  { %v1182_v33 = vpop.f32.mrf.mxu1 }
 0x386   :  { %1246 = vtanh.f32 %v357_v32  ;;  %v1101_v35 = vmul.f32 -1.442695, %v357_v32 }
 0x388   :  { %1248 = vpow2.f32 %v1101_v35 }
 0x393   :  { %v1247_v34 = vpop.eup %1246 }
 0x394   :  { %367 = vrot.lane.b32.xlu0 %v1247_v34, %s1304_s9 }
 0x395   :  { %v1249_v36 = vpop.eup %1248 }
 0x396   :  { %v361_v37 = vadd.f32 1.0, %v1249_v36 }
 0x398   :  { %1250 = vrcp.f32 %v361_v37 }
 0x3a5   :  { %v1251_v38 = vpop.eup %1250 }
 0x3a6   :  { %v365_v41 = vmul.f32 %v1251_v38, %v273_v25 }
 0x406   :  { %v368_v39 = vpop.permute.xlu0 %367 }
 0x407   :  { %v370_v40 = vmul.f32 %v1251_v38, %v368_v39 }
 0x409   :  { %372 = vrot.lane.b32.xlu1 %v370_v40, %s1305_s3 }
 0x47b   :  { %v373_v42 = vpop.permute.xlu1 %372 }
 0x47c   :  { %v375_v43 = vadd.f32 %v373_v42, %v365_v41 }
 0x47e   :  { %1252 = vtanh.f32 %v375_v43 }
 0x48b   :  { %v1253_v46 = vpop.eup %1252 }
 0x48c   :  { %378 = vrot.lane.b32.xlu0 %v1253_v46, %s1306_s10 }
 0x4fe   :  { %v379_v47 = vpop.permute.xlu0 %378 }
 0x4ff   :  { %v381_v48 = vmul.f32 %v1251_v38, %v379_v47 }
 0x501   :  { %386 = vrot.lane.b32.xlu1 %v381_v48, %s1307_s11  ;;  %v382_v10 = vmax.f32 %v1398_v28, %v381_v48  ;;  %v27_v28 = vld [vmem:[%s1525_s0 + $0x20] sm:$0xff] }
 0x502   :  { %1163 = vmatprep.mubr.msk.f32.mxu0 %vm40_vm0, %v27_v28 }
 0x503   :  { %1164 = vmatmul.mubr.msk.f32.gmra.mxu0 %vm40_vm0, %v28_v29 }
 0x504   :  { %1166 = vmatprep.mubr.msk.f32.mxu0 %vm40_vm0, %v29_v30 }
 0x507   :  { %1167 = vmatmul.mubr.msk.f32.gmra.mxu0 %vm40_vm0, %v30_v31 }
 0x508   :  { %1201 = vmatprep.mubr.msk.f32.mxu0 %vm1303_vm1, %v1302_v3 }
 0x573   :  { %v387_v53 = vpop.permute.xlu1 %386 }
 0x574   :  { %1188 = vmatmul.mubr.msk.f32.vlgmr.msra.gmra.mxu1 %vm40_vm0, %v387_v53 }
 0x575   :  { %1191 = vmatpush3.msra.mxu1 %v1359_v4  ;;  %1194 = vmatprep.mubr.msk.f32.mxu1 %vm1303_vm1, %v1302_v3 }
 0x576   :  { %1192 = vmatprep.subr.mxu1 %v1302_v3 }
 0x577   :  { %1193 = vmatpush3.msra.mxu1 %v1364_v5 }
 0x578   :  { %1204 = vmatprep.subr.mxu1 %v1302_v3 }
 0x5c3   :  { %v1165_v36 = vpop.f32.mrf.mxu0 }
 0x5c4   :  { %v157_v37 = vadd.f32 %v1165_v36, %v1389_v7 }
 0x5c5   :  { %v151_v38 = vpop.f32.mrf.mxu0 }
 0x5c6   :  { %176 = vst.msk [vmem:[#allocation2 + $0x28] sm:$0xff] %vm170_vm2, %v157_v37  ;;  %v152_v39 = vadd.f32 %v1389_v7, %v151_v38 }
 0x5c7   :  { %v1168_v40 = vpop.f32.mrf.mxu0 }
 0x5c8   :  { %175 = vst.msk [vmem:[#allocation2 + $0x20] sm:$0xff] %vm170_vm2, %v152_v39  ;;  %v167_v41 = vadd.f32 %v1168_v40, %v1389_v7 }
 0x5c9   :  { %v161_v42 = vpop.f32.mrf.mxu0 }
 0x5ca   :  { %178 = vst.msk [vmem:[#allocation2 + $0x38] sm:$0xff] %vm170_vm2, %v167_v41 }
 0x5cf   :  { %v590_v45 = vld [vmem:[#allocation2 + $0x20] sm:$0xff] }
 0x5d1   :  { %v899_v39 = vld [vmem:[#allocation2 + $0x38] sm:$0xff] }
 0x634   :  { %v456_v55 = vpop.f32.mrf.mxu1 }
 0x635   :  { %v460_v56 = vadd.f32 %v456_v55, %v384_v54 }
 0x636   :  { %v1189_v57 = vpop.f32.mrf.mxu1 }
 0x637   :  { %1254 = vtanh.f32 %v460_v56  ;;  %v1103_v59 = vmul.f32 -1.442695, %v460_v56 }
 0x639   :  { %1256 = vpow2.f32 %v1103_v59 }
 0x644   :  { %v1255_v58 = vpop.eup %1254 }
 0x645   :  { %470 = vrot.lane.b32.xlu0 %v1255_v58, %s1304_s9 }
 0x646   :  { %v1257_v60 = vpop.eup %1256 }
 0x647   :  { %v464_v61 = vadd.f32 1.0, %v1257_v60 }
 0x649   :  { %1258 = vrcp.f32 %v464_v61 }
 0x656   :  { %v1259_v62 = vpop.eup %1258 }
 0x657   :  { %v468_v1 = vmul.f32 %v1259_v62, %v375_v43  ;;  %v162_v43 = vadd.f32 %v1389_v7, %v161_v42 }
 0x659   :  { %177 = vst.msk [vmem:[#allocation2 + $0x30] sm:$0xff] %vm170_vm2, %v162_v43 }
 0x6b7   :  { %v471_v63 = vpop.permute.xlu0 %470 }
 0x6b8   :  { %v473_v0 = vmul.f32 %v1259_v62, %v471_v63  ;;  %v693_v63 = vld [vmem:[#allocation2 + $0x28] sm:$0xff] }
 0x6ba   :  { %475 = vrot.lane.b32.xlu1 %v473_v0, %s1305_s3 }
 0x72c   :  { %v476_v2 = vpop.permute.xlu1 %475 }
 0x72d   :  { %v478_v6 = vadd.f32 %v476_v2, %v468_v1 }
 0x72f   :  { %1260 = vtanh.f32 %v478_v6 }
 0x73c   :  { %v1261_v8 = vpop.eup %1260 }
 0x73d   :  { %481 = vrot.lane.b32.xlu0 %v1261_v8, %s1306_s10 }
 0x7af   :  { %v482_v9 = vpop.permute.xlu0 %481 }
 0x7b0   :  { %v484_v11 = vmul.f32 %v1259_v62, %v482_v9 }
 0x7b2   :  { %v1436_v12 = vmax.f32 %v382_v10, %v484_v11  ;;  %489 = vrot.lane.b32.xlu1 %v484_v11, %s1307_s11 }
 0x824   :  { %v490_v13 = vpop.permute.xlu1 %489 }
 0x825   :  { %1195 = vmatmul.mubr.msk.f32.vlgmr.msra.gmra.mxu1 %vm40_vm0, %v490_v13 }
 0x826   :  { %1205 = vmatpush3.msra.mxu1 %v1359_v4  ;;  %1208 = vmatprep.mubr.msk.f32.mxu1 %vm1303_vm1, %v1302_v3 }
 0x827   :  { %1206 = vmatprep.subr.mxu1 %v1302_v3 }
 0x828   :  { %1207 = vmatpush3.msra.mxu1 %v1364_v5 }
 0x829   :  { %1218 = vmatprep.subr.mxu1 %v1302_v3 }
 0x8e5   :  { %v559_v15 = vpop.f32.mrf.mxu1 }
 0x8e6   :  { %v563_v16 = vadd.f32 %v559_v15, %v487_v14 }
 0x8e7   :  { %v1196_v17 = vpop.f32.mrf.mxu1 }
 0x8e8   :  { %1262 = vtanh.f32 %v563_v16  ;;  %v1105_v19 = vmul.f32 -1.442695, %v563_v16 }
 0x8ea   :  { %1264 = vpow2.f32 %v1105_v19 }
 0x8f5   :  { %v1263_v18 = vpop.eup %1262 }
 0x8f6   :  { %573 = vrot.lane.b32.xlu0 %v1263_v18, %s1304_s9 }
 0x8f7   :  { %v1265_v20 = vpop.eup %1264 }
 0x8f8   :  { %v567_v21 = vadd.f32 1.0, %v1265_v20  ;;  %v796_v20 = vld [vmem:[#allocation2 + $0x30] sm:$0xff] }
 0x8fa   :  { %1266 = vrcp.f32 %v567_v21 }
 0x907   :  { %v1267_v22 = vpop.eup %1266 }
 0x908   :  { %v571_v25 = vmul.f32 %v1267_v22, %v478_v6 }
 0x968   :  { %v574_v23 = vpop.permute.xlu0 %573 }
 0x969   :  { %v576_v24 = vmul.f32 %v1267_v22, %v574_v23 }
 0x96b   :  { %578 = vrot.lane.b32.xlu1 %v576_v24, %s1305_s3 }
 0x9dd   :  { %v579_v26 = vpop.permute.xlu1 %578 }
 0x9de   :  { %v581_v27 = vadd.f32 %v579_v26, %v571_v25 }
 0x9e0   :  { %1268 = vtanh.f32 %v581_v27 }
 0x9ed   :  { %v1269_v32 = vpop.eup %1268 }
 0x9ee   :  { %584 = vrot.lane.b32.xlu0 %v1269_v32, %s1306_s10 }
 0xa60   :  { %v585_v33 = vpop.permute.xlu0 %584 }
 0xa61   :  { %v587_v34 = vmul.f32 %v1267_v22, %v585_v33 }
 0xa63   :  { %v588_v35 = vmax.f32 %v1436_v12, %v587_v34  ;;  %592 = vrot.lane.b32.xlu1 %v587_v34, %s1307_s11 }
 0xad5   :  { %v593_v44 = vpop.permute.xlu1 %592 }
 0xad6   :  { %1202 = vmatmul.mubr.msk.f32.vlgmr.msra.gmra.mxu0 %vm40_vm0, %v593_v44 }
 0xad7   :  { %1212 = vmatpush3.msra.mxu0 %v1359_v4  ;;  %1215 = vmatprep.mubr.msk.f32.mxu0 %vm1303_vm1, %v1302_v3 }
 0xad8   :  { %1213 = vmatprep.subr.mxu0 %v1302_v3 }
 0xad9   :  { %1214 = vmatpush3.msra.mxu0 %v1364_v5 }
 0xada   :  { %1225 = vmatprep.subr.mxu0 %v1302_v3 }
 0xb96   :  { %v662_v46 = vpop.f32.mrf.mxu0 }
 0xb97   :  { %v666_v47 = vadd.f32 %v662_v46, %v590_v45 }
 0xb98   :  { %v1203_v7 = vpop.f32.mrf.mxu0 }
 0xb99   :  { %1270 = vtanh.f32 %v666_v47  ;;  %v1107_v49 = vmul.f32 -1.442695, %v666_v47 }
 0xb9b   :  { %1272 = vpow2.f32 %v1107_v49 }
 0xba6   :  { %v1271_v48 = vpop.eup %1270 }
 0xba7   :  { %676 = vrot.lane.b32.xlu0 %v1271_v48, %s1304_s9 }
 0xba8   :  { %v1273_v50 = vpop.eup %1272 }
 0xba9   :  { %v670_v51 = vadd.f32 1.0, %v1273_v50 }
 0xbab   :  { %1274 = vrcp.f32 %v670_v51 }
 0xbb8   :  { %v1275_v52 = vpop.eup %1274 }
 0xbb9   :  { %v674_v55 = vmul.f32 %v1275_v52, %v581_v27 }
 0xc19   :  { %v677_v53 = vpop.permute.xlu0 %676 }
 0xc1a   :  { %v679_v54 = vmul.f32 %v1275_v52, %v677_v53  ;;  %v1001_v53 = vld [vmem:[%s1528_s4] sm:$0xff] }
 0xc1c   :  { %681 = vrot.lane.b32.xlu1 %v679_v54, %s1305_s3 }
 0xc8e   :  { %v682_v56 = vpop.permute.xlu1 %681 }
 0xc8f   :  { %v684_v57 = vadd.f32 %v682_v56, %v674_v55 }
 0xc91   :  { %1276 = vtanh.f32 %v684_v57 }
 0xc9e   :  { %v1277_v58 = vpop.eup %1276 }
 0xc9f   :  { %687 = vrot.lane.b32.xlu0 %v1277_v58, %s1306_s10 }
 0xd11   :  { %v688_v59 = vpop.permute.xlu0 %687 }
 0xd12   :  { %v690_v60 = vmul.f32 %v1275_v52, %v688_v59  ;;  %v1002_v52 = vld [vmem:[%s1528_s4 + $0x8] sm:$0xff]  ;;  %v1114_v59 = vld [vmem:[%s1529_s5] ss:$0 sm:$0xff] }
 0xd14   :  { %v691_v61 = vmax.f32 %v588_v35, %v690_v60  ;;  %695 = vrot.lane.b32.xlu1 %v690_v60, %s1307_s11 }
 0xd86   :  { %v696_v62 = vpop.permute.xlu1 %695 }
 0xd87   :  { %1209 = vmatmul.mubr.msk.f32.vlgmr.msra.gmra.mxu1 %vm40_vm0, %v696_v62 }
 0xd88   :  { %1219 = vmatpush3.msra.mxu1 %v1359_v4  ;;  %1222 = vmatprep.mubr.msk.f32.mxu1 %vm1303_vm1, %v1302_v3 }
 0xd89   :  { %1220 = vmatprep.subr.mxu1 %v1302_v3 }
 0xd8a   :  { %1221 = vmatpush3.msra.mxu1 %v1364_v5 }
 0xe47   :  { %v765_v0 = vpop.f32.mrf.mxu1 }
 0xe48   :  { %v769_v1 = vadd.f32 %v765_v0, %v693_v63 }
 0xe49   :  { %v1210_v2 = vpop.f32.mrf.mxu1 }
 0xe4a   :  { %1278 = vtanh.f32 %v769_v1  ;;  %v1109_v8 = vmul.f32 -1.442695, %v769_v1 }
 0xe4c   :  { %1280 = vpow2.f32 %v1109_v8 }
 0xe57   :  { %v1279_v6 = vpop.eup %1278 }
 0xe58   :  { %779 = vrot.lane.b32.xlu0 %v1279_v6, %s1304_s9 }
 0xe59   :  { %v1281_v9 = vpop.eup %1280 }
 0xe5a   :  { %v773_v10 = vadd.f32 1.0, %v1281_v9 }
 0xe5c   :  { %1282 = vrcp.f32 %v773_v10 }
 0xe69   :  { %v1283_v4 = vpop.eup %1282 }
 0xe6a   :  { %v777_v13 = vmul.f32 %v1283_v4, %v684_v57 }
 0xeca   :  { %v780_v11 = vpop.permute.xlu0 %779 }
 0xecb   :  { %v782_v12 = vmul.f32 %v1283_v4, %v780_v11 }
 0xecd   :  { %784 = vrot.lane.b32.xlu1 %v782_v12, %s1305_s3 }
 0xf3f   :  { %v785_v5 = vpop.permute.xlu1 %784 }
 0xf40   :  { %v787_v14 = vadd.f32 %v785_v5, %v777_v13 }
 0xf42   :  { %1284 = vtanh.f32 %v787_v14 }
 0xf4f   :  { %v1285_v15 = vpop.eup %1284 }
 0xf50   :  { %790 = vrot.lane.b32.xlu0 %v1285_v15, %s1306_s10 }
 0xfc2   :  { %v791_v16 = vpop.permute.xlu0 %790 }
 0xfc3   :  { %v793_v17 = vmul.f32 %v1283_v4, %v791_v16 }
 0xfc5   :  { %v794_v18 = vmax.f32 %v691_v61, %v793_v17  ;;  %798 = vrot.lane.b32.xlu1 %v793_v17, %s1307_s11 }
0x1037   :  { %v799_v19 = vpop.permute.xlu1 %798 }
0x1038   :  { %1216 = vmatmul.mubr.msk.f32.vlgmr.msra.gmra.mxu0 %vm40_vm0, %v799_v19 }
0x1039   :  { %1229 = vmatprep.mubr.msk.f32.mxu0 %vm1303_vm1, %v1302_v3  ;;  %1226 = vmatpush3.msra.mxu0 %v1002_v52 }
0x103a   :  { %1227 = vmatprep.subr.mxu0 %v1302_v3 }
0x103b   :  { %1228 = vmatpush3.msra.mxu0 %v1001_v53 }
0x10f8   :  { %v868_v21 = vpop.f32.mrf.mxu0 }
0x10f9   :  { %v872_v22 = vadd.f32 %v868_v21, %v796_v20 }
0x10fa   :  { %v1217_v23 = vpop.f32.mrf.mxu0 }
0x10fb   :  { %1286 = vtanh.f32 %v872_v22  ;;  %v1111_v25 = vmul.f32 -1.442695, %v872_v22 }
0x10fd   :  { %1288 = vpow2.f32 %v1111_v25 }
0x1108   :  { %v1287_v24 = vpop.eup %1286 }
0x1109   :  { %882 = vrot.lane.b32.xlu0 %v1287_v24, %s1304_s9 }
0x110a   :  { %v1289_v26 = vpop.eup %1288 }
0x110b   :  { %v876_v27 = vadd.f32 1.0, %v1289_v26 }
0x110d   :  { %1290 = vrcp.f32 %v876_v27 }
0x111a   :  { %v1291_v28 = vpop.eup %1290 }
0x111b   :  { %v880_v31 = vmul.f32 %v1291_v28, %v787_v14 }
0x117b   :  { %v883_v29 = vpop.permute.xlu0 %882 }
0x117c   :  { %v885_v30 = vmul.f32 %v1291_v28, %v883_v29 }
0x117e   :  { %887 = vrot.lane.b32.xlu1 %v885_v30, %s1305_s3 }
0x11f0   :  { %v888_v32 = vpop.permute.xlu1 %887 }
0x11f1   :  { %v890_v33 = vadd.f32 %v888_v32, %v880_v31 }
0x11f3   :  { %1292 = vtanh.f32 %v890_v33 }
0x1200   :  { %v1293_v34 = vpop.eup %1292 }
0x1201   :  { %893 = vrot.lane.b32.xlu0 %v1293_v34, %s1306_s10 }
0x1273   :  { %v894_v35 = vpop.permute.xlu0 %893 }
0x1274   :  { %v896_v36 = vmul.f32 %v1291_v28, %v894_v35 }
0x1276   :  { %v897_v37 = vmax.f32 %v794_v18, %v896_v36  ;;  %901 = vrot.lane.b32.xlu1 %v896_v36, %s1307_s11 }
0x12e8   :  { %v902_v38 = vpop.permute.xlu1 %901 }
0x12e9   :  { %1223 = vmatmul.mubr.msk.f32.vlgmr.msra.gmra.mxu1 %vm40_vm0, %v902_v38 }
0x13a9   :  { %v971_v40 = vpop.f32.mrf.mxu1 }
0x13aa   :  { %v975_v41 = vadd.f32 %v971_v40, %v899_v39 }
0x13ab   :  { %v1224_v42 = vpop.f32.mrf.mxu1 }
0x13ac   :  { %1294 = vtanh.f32 %v975_v41  ;;  %v1113_v44 = vmul.f32 -1.442695, %v975_v41 }
0x13ae   :  { %1296 = vpow2.f32 %v1113_v44 }
0x13b9   :  { %v1295_v43 = vpop.eup %1294 }
0x13ba   :  { %985 = vrot.lane.b32.xlu0 %v1295_v43, %s1304_s9 }
0x13bb   :  { %v1297_v45 = vpop.eup %1296 }
0x13bc   :  { %v979_v46 = vadd.f32 1.0, %v1297_v45 }
0x13be   :  { %1298 = vrcp.f32 %v979_v46 }
0x13cb   :  { %v1299_v47 = vpop.eup %1298 }
0x13cc   :  { %v983_v49 = vmul.f32 %v1299_v47, %v890_v33 }
0x142c   :  { %v986_v7 = vpop.permute.xlu0 %985 }
0x142d   :  { %v988_v48 = vmul.f32 %v1299_v47, %v986_v7 }
0x142f   :  { %990 = vrot.lane.b32.xlu1 %v988_v48, %s1305_s3 }
0x14a1   :  { %v991_v50 = vpop.permute.xlu1 %990 }
0x14a2   :  { %v993_v51 = vadd.f32 %v991_v50, %v983_v49 }
0x14a4   :  { %1300 = vtanh.f32 %v993_v51 }
0x14b1   :  { %v1301_v54 = vpop.eup %1300 }
0x14b2   :  { %996 = vrot.lane.b32.xlu0 %v1301_v54, %s1306_s10 }
0x1524   :  { %v997_v55 = vpop.permute.xlu0 %996 }
0x1525   :  { %v999_v56 = vmul.f32 %v1299_v47, %v997_v55 }
0x1527   :  { %v1000_v57 = vmax.f32 %v897_v37, %v999_v56 }
0x1529   :  { %1011 = vrot.lane.b32.xlu1 %v1000_v57, %s1307_s11 }
0x159b   :  { %v1012_v58 = vpop.permute.xlu1 %1011 }
0x159c   :  { %1230 = vmatmul.mubr.msk.f32.vlgmr.msra.gmra.mxu0 %vm40_vm0, %v1012_v58 }
0x165c   :  { %v1081_v60 = vpop.f32.mrf.mxu0 }
0x165d   :  { %v1082_v61 = vadd.f32 %v1114_v59, %v1081_v60 }
0x165e   :  { %v1231_v62 = vpop.f32.mrf.mxu0 }
0x165f   :  { %1085 = vst [vmem:[%s1530_s6] sm:$0xff] %v1082_v61 }

</bundles_post_ra>
